<compile_context>
chip_gen: v5e
topology: v5e:2x2
jax: 0.10.0
libtpu: 0.0.40
codegen_flags: <defaults>
</compile_context>

<pallas_src>
import jax
import jax.numpy as jnp
from jax import lax
from jax.experimental import pallas as pl
from jax.experimental.pallas import tpu as pltpu


# -----------------------------------------------------------------------------
# helpers
# -----------------------------------------------------------------------------
def _pick_tile(n, prefs):
    """Largest preferred tile that divides n, else the full extent."""
    for p in prefs:
        if n % p == 0:
            return p
    return n


# -----------------------------------------------------------------------------
# fused AttentionLayer + classifier head kernel (online softmax over the sequence)
# -----------------------------------------------------------------------------
def _attn_head_kernel(x_ref, wT_ref, ba_ref, v_ref,
                      w1T_ref, b1_ref, w2T_ref, b2_ref,
                      logits_ref, ctx_ref, w_ref,
                      m_sc, l_sc, acc_sc):
    s_idx = pl.program_id(1)
    n_seq = pl.num_programs(1)
    TB, TS, H = x_ref.shape

    @pl.when(s_idx == 0)
    def _():
        m_sc[...] = jnp.full_like(m_sc, -jnp.inf)
        l_sc[...] = jnp.zeros_like(l_sc)
        acc_sc[...] = jnp.zeros_like(acc_sc)

    x = x_ref[...]                                               # (TB, TS, H) native dtype
    # One MXU matmul with M = TB*TS (no per-batch tiny matmuls); f32 accumulation.
    proj = jnp.dot(x.reshape(TB * TS, H), wT_ref[...],
                   preferred_element_type=jnp.float32)
    proj = proj + ba_ref[...].astype(jnp.float32)
    t = jnp.tanh(proj).reshape(TB, TS, H)                        # EUP/VPU math in f32

    # context-vector scores: VPU multiply + lane reduction (kept off the MXU: N=1)
    scores = jnp.sum(t * v_ref[...].astype(jnp.float32)[None, :, :], axis=-1)  # (TB, TS)

    # Store RAW scores into the resident output block; normalized once at the end.
    w_ref[s_idx] = scores

    # ---- online softmax update ----------------------------------------------
    m_prev = m_sc[...]                                           # (TB, 1)
    m_new = jnp.maximum(m_prev, jnp.max(scores, axis=-1, keepdims=True))
    alpha = jnp.exp(m_prev - m_new)                              # rescale of older tiles
    e = jnp.exp(scores - m_new)                                  # (TB, TS) unnormalized
    l_sc[...] = alpha * l_sc[...] + jnp.sum(e, axis=-1, keepdims=True)
    # weighted partial context: VPU broadcast-multiply + sublane reduction
    acc_sc[...] = alpha * acc_sc[...] + jnp.sum(e[:, :, None] * x.astype(jnp.float32),
                                                axis=1)
    m_sc[...] = m_new

    # ---- finalize: normalize, emit context / weights, run the classifier head ----
    @pl.when(s_idx == n_seq - 1)
    def _():
        inv_l = pl.reciprocal(l_sc[...], approx=True)            # EUP approx
        inv_l = inv_l * (2.0 - l_sc[...] * inv_l)                # one NR step -> f32 acc.
        ctx = acc_sc[...] * inv_l                                # (TB, H) f32
        ctx_ref[...] = ctx.astype(ctx_ref.dtype)
        # single pass over the stored raw scores -> softmax probabilities
        w_ref[...] = jnp.exp(w_ref[...] - m_sc[...][None, :, :]) * inv_l[None, :, :]
        # fc1 -> ReLU -> fc2 on the f32 context still in vregs
        h = jnp.dot(ctx, w1T_ref[...].astype(jnp.float32),
                    preferred_element_type=jnp.float32)
        h = jnp.maximum(h + b1_ref[...].astype(jnp.float32), 0.0)
        o = jnp.dot(h, w2T_ref[...].astype(jnp.float32),
                    preferred_element_type=jnp.float32)
        logits_ref[...] = (o + b2_ref[...].astype(jnp.float32)).astype(logits_ref.dtype)


def attention_classifier(lstm_output, w_attn, b_attn, v_ctx, w1, b1, w2, b2):
    """Fused Pallas forward of AttentionLayer + (fc1 -> ReLU -> fc2).

    lstm_output: (B, S, H); w_attn: (H, H) PyTorch Linear weight; b_attn: (H,);
    v_ctx: (1, H) context_vector weight (no bias); w1: (H/2, H); b1: (H/2,);
    w2: (C, H/2); b2: (C,).
    Returns (logits (B, C), context (B, H), attention_weights (B, S) in f32).
    """
    B, S, H = lstm_output.shape
    Hh = w1.shape[0]
    C = w2.shape[0]
    TB = _pick_tile(B, (64, 32, 16, 8))           # multiple of 8 or the whole batch
    TS = _pick_tile(S, (512, 256, 128))           # lane-dense seq tiles for large S
    n_bt, n_st = B // TB, S // TS

    wT = jnp.asarray(w_attn).T                    # (H, H): x @ W^T as a plain matmul
    ba = jnp.asarray(b_attn).reshape(1, H)
    v2 = jnp.asarray(v_ctx).reshape(1, H)
    w1T = jnp.asarray(w1).T                       # (H, Hh)
    b1r = jnp.asarray(b1).reshape(1, Hh)
    w2T = jnp.asarray(w2).T                       # (Hh, C)
    b2r = jnp.asarray(b2).reshape(1, C)

    # VMEM budget: double-buffered x tile + resident weights/outputs/scratch, with
    # margin, clamped so it is valid on v5e/v6e (128 MiB) and v7x (64 MiB physical).
    itemsize = jnp.dtype(lstm_output.dtype).itemsize
    est = (2 * TB * TS * H * itemsize
           + 4 * (H * H + 2 * H + H * Hh + Hh + Hh * C + C)
           + 4 * (TB * C + TB * H + n_st * TB * TS)
           + 4 * TB * (H + 2))
    vmem_limit = int(min(max(2 * est + (2 << 20), 16 * 1024 * 1024), 64 * 1024 * 1024))

    logits, ctx, w_tiles = pl.pallas_call(
        _attn_head_kernel,
        out_shape=(jax.ShapeDtypeStruct((B, C), lstm_output.dtype),
                   jax.ShapeDtypeStruct((B, H), lstm_output.dtype),
                   jax.ShapeDtypeStruct((n_st, B, TS), jnp.float32)),
        grid_spec=pltpu.PrefetchScalarGridSpec(
            num_scalar_prefetch=0,
            grid=(n_bt, n_st),                    # batch parallel, seq = reduction (last)
            in_specs=[
                pl.BlockSpec((TB, TS, H), lambda b, s: (b, s, 0)),
                pl.BlockSpec((H, H), lambda b, s: (0, 0)),       # resident weights
                pl.BlockSpec((1, H), lambda b, s: (0, 0)),
                pl.BlockSpec((1, H), lambda b, s: (0, 0)),
                pl.BlockSpec((H, Hh), lambda b, s: (0, 0)),
                pl.BlockSpec((1, Hh), lambda b, s: (0, 0)),
                pl.BlockSpec((Hh, C), lambda b, s: (0, 0)),
                pl.BlockSpec((1, C), lambda b, s: (0, 0)),
            ],
            out_specs=[
                pl.BlockSpec((TB, C), lambda b, s: (b, 0)),      # resident across seq
                pl.BlockSpec((TB, H), lambda b, s: (b, 0)),
                pl.BlockSpec((n_st, TB, TS), lambda b, s: (0, b, 0)),
            ],
            scratch_shapes=[
                pltpu.VMEM((TB, 1), jnp.float32),   # running max
                pltpu.VMEM((TB, 1), jnp.float32),   # running denom
                pltpu.VMEM((TB, H), jnp.float32),   # f32 context accumulator
            ]),
        compiler_params=pltpu.CompilerParams(
            dimension_semantics=("parallel", "arbitrary"),
            vmem_limit_bytes=vmem_limit),
    )(lstm_output, wT, ba, v2, w1T, b1r, w2T, b2r)

    # (n_st, B, TS) -> (B, S); pure layout plumbing in the wrapper.
    weights = jnp.transpose(w_tiles, (1, 0, 2)).reshape(B, S)
    return logits, ctx, weights


# -----------------------------------------------------------------------------
# plain-JAX pieces: embedding gather + 2-layer bidirectional LSTM (see TODO above)
# -----------------------------------------------------------------------------
def embed(token_ids, emb_table):
    return jnp.take(emb_table, token_ids, axis=0)


def _lstm_direction(x_seq, w_ih, w_hh, b_ih, b_hh):
    """x_seq: (S, B, in) -> (S, B, Hd); PyTorch gate order (i, f, g, o)."""
    Hd = w_hh.shape[1]
    Bsz = x_seq.shape[1]

    def step(carry, x_t):
        h, c = carry
        g = x_t @ w_ih.T + h @ w_hh.T + b_ih + b_hh
        i = jax.nn.sigmoid(g[:, 0 * Hd:1 * Hd])
        f = jax.nn.sigmoid(g[:, 1 * Hd:2 * Hd])
        gg = jnp.tanh(g[:, 2 * Hd:3 * Hd])
        o = jax.nn.sigmoid(g[:, 3 * Hd:4 * Hd])
        c = f * c + i * gg
        h = o * jnp.tanh(c)
        return (h, c), h

    init = (jnp.zeros((Bsz, Hd), x_seq.dtype), jnp.zeros((Bsz, Hd), x_seq.dtype))
    _, hs = lax.scan(step, init, x_seq)
    return hs


def bilstm(x, layers):
    """x: (B, S, E); layers: [(fwd_params, bwd_params), ...] -> (B, S, 2*Hd)."""
    xs = jnp.swapaxes(x, 0, 1)                       # (S, B, E)
    for fwd, bwd in layers:
        h_f = _lstm_direction(xs, *fwd)
        h_b = _lstm_direction(xs[::-1], *bwd)[::-1]
        xs = jnp.concatenate([h_f, h_b], axis=-1)
    return jnp.swapaxes(xs, 0, 1)


# -----------------------------------------------------------------------------
# full forward + parameters + reference
# -----------------------------------------------------------------------------
def init_params(key, vocab_size, embedding_dim, hidden_dim, num_classes, num_layers):
    Hd = hidden_dim // 2
    ki = iter(jax.random.split(key, 64))

    def u(shape, bound):
        return jax.random.uniform(next(ki), shape, minval=-bound, maxval=bound,
                                  dtype=jnp.float32)

    params = {"embedding": jax.random.normal(next(ki), (vocab_size, embedding_dim),
                                             jnp.float32)}
    lstm_layers = []
    bound = 1.0 / (Hd ** 0.5)
    in_size = embedding_dim
    for _ in range(num_layers):
        layer = []
        for _d in range(2):                          # forward / backward
            layer.append((u((4 * Hd, in_size), bound), u((4 * Hd, Hd), bound),
                          u((4 * Hd,), bound), u((4 * Hd,), bound)))
        lstm_layers.append(tuple(layer))
        in_size = 2 * Hd
    params["lstm"] = lstm_layers

    ab = 1.0 / (hidden_dim ** 0.5)
    params["attn_w"] = u((hidden_dim, hidden_dim), ab)
    params["attn_b"] = u((hidden_dim,), ab)
    params["ctx_v"] = u((1, hidden_dim), ab)
    params["fc1_w"] = u((hidden_dim // 2, hidden_dim), ab)
    params["fc1_b"] = u((hidden_dim // 2,), ab)
    f2b = 1.0 / ((hidden_dim // 2) ** 0.5)
    params["fc2_w"] = u((num_classes, hidden_dim // 2), f2b)
    params["fc2_b"] = u((num_classes,), f2b)
    return params


def sentiment_forward(params, token_ids):
    emb = embed(token_ids, params["embedding"])            # dropout = identity (eval)
    lstm_out = bilstm(emb, params["lstm"])                 # (B, S, hidden_dim)
    logits, ctx, attn_w = attention_classifier(
        lstm_out, params["attn_w"], params["attn_b"], params["ctx_v"],
        params["fc1_w"], params["fc1_b"], params["fc2_w"], params["fc2_b"])
    return logits, ctx, attn_w


def sentiment_forward_reference(params, token_ids):
    emb = embed(token_ids, params["embedding"])
    lstm_out = bilstm(emb, params["lstm"])
    t = jnp.tanh(jnp.einsum('bsh,kh->bsk', lstm_out, params["attn_w"]) + params["attn_b"])
    s = jnp.einsum('bsh,oh->bso', t, params["ctx_v"])[..., 0]
    w = jax.nn.softmax(s, axis=1)
    ctx = jnp.einsum('bs,bsh->bh', w, lstm_out)
    h = jax.nn.relu(ctx @ params["fc1_w"].T + params["fc1_b"])
    logits = h @ params["fc2_w"].T + params["fc2_b"]
    return logits, ctx, w


if __name__ == "__main__":
    vocab_size, embedding_dim, hidden_dim, num_classes, num_layers = 50, 16, 32, 3, 2
    B, S = 2, 8

    key = jax.random.PRNGKey(0)
    kp, kx = jax.random.split(key)
    params = init_params(kp, vocab_size, embedding_dim, hidden_dim, num_classes,
                         num_layers)
    token_ids = jax.random.randint(kx, (B, S), 0, vocab_size)

    fwd = jax.jit(sentiment_forward)
    logits, ctx, attn_w = fwd(params, token_ids)
    jax.block_until_ready((logits, ctx, attn_w))

    logits_exp, ctx_exp, w_exp = sentiment_forward_reference(params, token_ids)

    assert logits.shape == (B, num_classes)
    assert ctx.shape == (B, hidden_dim) and attn_w.shape == (B, S)
    assert jnp.allclose(jnp.sum(attn_w, axis=1), 1.0, atol=1e-5)
    assert jnp.allclose(attn_w, w_exp, atol=1e-5, rtol=1e-4)
    assert jnp.allclose(ctx, ctx_exp, atol=1e-4, rtol=1e-4)
    assert jnp.allclose(logits, logits_exp, atol=1e-4, rtol=1e-4)

    print("KERNEL_OK")
</pallas_src>

<mosaic_0001>
module attributes {stable_mosaic.version = 11 : i64} {
  func.func @_attn_head_kernel(%arg0: i32, %arg1: i32, %arg2: memref<2x8x32xf32, #tpu.memory_space<vmem>>, %arg3: memref<32x32xf32, #tpu.memory_space<vmem>>, %arg4: memref<1x32xf32, #tpu.memory_space<vmem>>, %arg5: memref<1x32xf32, #tpu.memory_space<vmem>>, %arg6: memref<32x16xf32, #tpu.memory_space<vmem>>, %arg7: memref<1x16xf32, #tpu.memory_space<vmem>>, %arg8: memref<16x3xf32, #tpu.memory_space<vmem>>, %arg9: memref<1x3xf32, #tpu.memory_space<vmem>>, %arg10: memref<2x3xf32, #tpu.memory_space<vmem>>, %arg11: memref<2x32xf32, #tpu.memory_space<vmem>>, %arg12: memref<1x2x8xf32, #tpu.memory_space<vmem>>, %arg13: memref<2x1xf32, #tpu.memory_space<vmem>>, %arg14: memref<2x1xf32, #tpu.memory_space<vmem>>, %arg15: memref<2x32xf32, #tpu.memory_space<vmem>>) attributes {dimension_semantics = [#tpu.dimension_semantics<parallel>, #tpu.dimension_semantics<arbitrary>], iteration_bounds = array<i64: 1, 1>, scalar_prefetch = 0 : i64, scratch_operands = 3 : i64, tpu.core_type = #tpu.core_type<tc>, window_params = [{transform_indices = @transform_0, window_bounds = array<i64: 2, 8, 32>}, {pipeline_mode = #tpu.pipeline_mode<synchronous>, transform_indices = @transform_1, window_bounds = array<i64: 32, 32>}, {pipeline_mode = #tpu.pipeline_mode<synchronous>, transform_indices = @transform_2, window_bounds = array<i64: 1, 32>}, {pipeline_mode = #tpu.pipeline_mode<synchronous>, transform_indices = @transform_3, window_bounds = array<i64: 1, 32>}, {pipeline_mode = #tpu.pipeline_mode<synchronous>, transform_indices = @transform_4, window_bounds = array<i64: 32, 16>}, {pipeline_mode = #tpu.pipeline_mode<synchronous>, transform_indices = @transform_5, window_bounds = array<i64: 1, 16>}, {pipeline_mode = #tpu.pipeline_mode<synchronous>, transform_indices = @transform_6, window_bounds = array<i64: 16, 3>}, {pipeline_mode = #tpu.pipeline_mode<synchronous>, transform_indices = @transform_7, window_bounds = array<i64: 1, 3>}, {transform_indices = @transform_8, window_bounds = array<i64: 2, 3>}, {transform_indices = @transform_9, window_bounds = array<i64: 2, 32>}, {transform_indices = @transform_10, window_bounds = array<i64: 1, 2, 8>}]} {
    %c0_i32 = arith.constant 0 : i32
    %0 = arith.cmpi eq, %arg1, %c0_i32 : i32
    %1 = arith.extui %0 : i1 to i32
    %c0_i32_0 = arith.constant 0 : i32
    %2 = arith.cmpi ne, %1, %c0_i32_0 : i32
    scf.if %2 {
      %cst_29 = arith.constant 0xFF800000 : f32
      %49 = vector.broadcast %cst_29 : f32 to vector<2x1xf32>
      %c0_30 = arith.constant 0 : index
      %c0_31 = arith.constant 0 : index
      %50 = vector.load %arg13[%c0_30, %c0_31] : memref<2x1xf32, #tpu.memory_space<vmem>>, vector<2x1xf32>
      tpu.vector_store %arg13[%c0_30, %c0_31], %49 {strides = array<i32>} : memref<2x1xf32, #tpu.memory_space<vmem>>, vector<2x1xf32>,
      %cst_32 = arith.constant 0.000000e+00 : f32
      %51 = vector.broadcast %cst_32 : f32 to vector<2x1xf32>
      %c0_33 = arith.constant 0 : index
      %c0_34 = arith.constant 0 : index
      %52 = vector.load %arg14[%c0_33, %c0_34] : memref<2x1xf32, #tpu.memory_space<vmem>>, vector<2x1xf32>
      tpu.vector_store %arg14[%c0_33, %c0_34], %51 {strides = array<i32>} : memref<2x1xf32, #tpu.memory_space<vmem>>, vector<2x1xf32>,
      %cst_35 = arith.constant 0.000000e+00 : f32
      %53 = vector.broadcast %cst_35 : f32 to vector<2x32xf32>
      %c0_36 = arith.constant 0 : index
      %c0_37 = arith.constant 0 : index
      %54 = vector.load %arg15[%c0_36, %c0_37] : memref<2x32xf32, #tpu.memory_space<vmem>>, vector<2x32xf32>
      tpu.vector_store %arg15[%c0_36, %c0_37], %53 {strides = array<i32>} : memref<2x32xf32, #tpu.memory_space<vmem>>, vector<2x32xf32>,
    } else {
    }
    %c0 = arith.constant 0 : index
    %c0_1 = arith.constant 0 : index
    %c0_2 = arith.constant 0 : index
    %3 = vector.load %arg2[%c0, %c0_1, %c0_2] : memref<2x8x32xf32, #tpu.memory_space<vmem>>, vector<2x8x32xf32>
    %4 = vector.shape_cast %3 : vector<2x8x32xf32> to vector<16x32xf32>
    %c0_3 = arith.constant 0 : index
    %c0_4 = arith.constant 0 : index
    %5 = vector.load %arg3[%c0_3, %c0_4] : memref<32x32xf32, #tpu.memory_space<vmem>>, vector<32x32xf32>
    %cst = arith.constant dense<0.000000e+00> : vector<16x32xf32>
    %6 = tpu.matmul %4, %5, %cst {dimension_numbers = #tpu.dot_dimension_numbers<[1], [0], [0], [1], [0, 0, 1, 1], [], []>} : vector<16x32xf32>, vector<32x32xf32>, vector<16x32xf32> -> vector<16x32xf32>
    %c0_5 = arith.constant 0 : index
    %c0_6 = arith.constant 0 : index
    %7 = vector.load %arg4[%c0_5, %c0_6] : memref<1x32xf32, #tpu.memory_space<vmem>>, vector<1x32xf32>
    %8 = vector.broadcast %7 : vector<1x32xf32> to vector<16x32xf32>
    %9 = arith.addf %6, %8 : vector<16x32xf32>
    %10 = math.tanh %9 : vector<16x32xf32>
    %11 = vector.shape_cast %10 : vector<16x32xf32> to vector<2x8x32xf32>
    %c0_7 = arith.constant 0 : index
    %c0_8 = arith.constant 0 : index
    %12 = vector.load %arg5[%c0_7, %c0_8] : memref<1x32xf32, #tpu.memory_space<vmem>>, vector<1x32xf32>
    %13 = vector.shape_cast %12 : vector<1x32xf32> to vector<1x1x32xf32>
    %14 = vector.broadcast %13 : vector<1x1x32xf32> to vector<2x8x32xf32>
    %15 = arith.mulf %11, %14 : vector<2x8x32xf32>
    %cst_9 = arith.constant dense<0.000000e+00> : vector<2x8xf32>
    %16 = vector.multi_reduction <add>, %15, %cst_9 [2] : vector<2x8x32xf32> to vector<2x8xf32>
    %17 = arith.index_cast %arg1 : i32 to index
    %c0_10 = arith.constant 0 : index
    %c0_11 = arith.constant 0 : index
    %18 = vector.load %arg12[%17, %c0_10, %c0_11] : memref<1x2x8xf32, #tpu.memory_space<vmem>>, vector<1x2x8xf32>
    %19 = vector.shape_cast %18 : vector<1x2x8xf32> to vector<2x8xf32>
    %20 = vector.shape_cast %16 : vector<2x8xf32> to vector<1x2x8xf32>
    tpu.vector_store %arg12[%17, %c0_10, %c0_11], %20 {strides = array<i32>} : memref<1x2x8xf32, #tpu.memory_space<vmem>>, vector<1x2x8xf32>,
    %c0_12 = arith.constant 0 : index
    %c0_13 = arith.constant 0 : index
    %21 = vector.load %arg13[%c0_12, %c0_13] : memref<2x1xf32, #tpu.memory_space<vmem>>, vector<2x1xf32>
    %cst_14 = arith.constant dense<0xFF800000> : vector<2xf32>
    %22 = vector.multi_reduction <maximumf>, %16, %cst_14 [1] : vector<2x8xf32> to vector<2xf32>
    %23 = vector.shape_cast %22 : vector<2xf32> to vector<2x1xf32>
    %24 = arith.maximumf %21, %23 : vector<2x1xf32>
    %25 = arith.subf %21, %24 : vector<2x1xf32>
    %26 = math.exp %25 : vector<2x1xf32>
    %27 = vector.broadcast %24 : vector<2x1xf32> to vector<2x8xf32>
    %28 = arith.subf %16, %27 : vector<2x8xf32>
    %29 = math.exp %28 : vector<2x8xf32>
    %c0_15 = arith.constant 0 : index
    %c0_16 = arith.constant 0 : index
    %30 = vector.load %arg14[%c0_15, %c0_16] : memref<2x1xf32, #tpu.memory_space<vmem>>, vector<2x1xf32>
    %31 = arith.mulf %26, %30 : vector<2x1xf32>
    %cst_17 = arith.constant dense<0.000000e+00> : vector<2xf32>
    %32 = vector.multi_reduction <add>, %29, %cst_17 [1] : vector<2x8xf32> to vector<2xf32>
    %33 = vector.shape_cast %32 : vector<2xf32> to vector<2x1xf32>
    %34 = arith.addf %31, %33 : vector<2x1xf32>
    %c0_18 = arith.constant 0 : index
    %c0_19 = arith.constant 0 : index
    %35 = vector.load %arg14[%c0_18, %c0_19] : memref<2x1xf32, #tpu.memory_space<vmem>>, vector<2x1xf32>
    tpu.vector_store %arg14[%c0_18, %c0_19], %34 {strides = array<i32>} : memref<2x1xf32, #tpu.memory_space<vmem>>, vector<2x1xf32>,
    %c0_20 = arith.constant 0 : index
    %c0_21 = arith.constant 0 : index
    %36 = vector.load %arg15[%c0_20, %c0_21] : memref<2x32xf32, #tpu.memory_space<vmem>>, vector<2x32xf32>
    %37 = vector.broadcast %26 : vector<2x1xf32> to vector<2x32xf32>
    %38 = arith.mulf %37, %36 : vector<2x32xf32>
    %39 = vector.shape_cast %29 : vector<2x8xf32> to vector<2x8x1xf32>
    %40 = vector.broadcast %39 : vector<2x8x1xf32> to vector<2x8x32xf32>
    %41 = arith.mulf %40, %3 : vector<2x8x32xf32>
    %cst_22 = arith.constant dense<0.000000e+00> : vector<2x32xf32>
    %42 = vector.multi_reduction <add>, %41, %cst_22 [1] : vector<2x8x32xf32> to vector<2x32xf32>
    %43 = arith.addf %38, %42 : vector<2x32xf32>
    %c0_23 = arith.constant 0 : index
    %c0_24 = arith.constant 0 : index
    %44 = vector.load %arg15[%c0_23, %c0_24] : memref<2x32xf32, #tpu.memory_space<vmem>>, vector<2x32xf32>
    tpu.vector_store %arg15[%c0_23, %c0_24], %43 {strides = array<i32>} : memref<2x32xf32, #tpu.memory_space<vmem>>, vector<2x32xf32>,
    %c0_25 = arith.constant 0 : index
    %c0_26 = arith.constant 0 : index
    %45 = vector.load %arg13[%c0_25, %c0_26] : memref<2x1xf32, #tpu.memory_space<vmem>>, vector<2x1xf32>
    tpu.vector_store %arg13[%c0_25, %c0_26], %24 {strides = array<i32>} : memref<2x1xf32, #tpu.memory_space<vmem>>, vector<2x1xf32>,
    %c0_i32_27 = arith.constant 0 : i32
    %46 = arith.cmpi eq, %arg1, %c0_i32_27 : i32
    %47 = arith.extui %46 : i1 to i32
    %c0_i32_28 = arith.constant 0 : i32
    %48 = arith.cmpi ne, %47, %c0_i32_28 : i32
    scf.if %48 {
      %c0_29 = arith.constant 0 : index
      %c0_30 = arith.constant 0 : index
      %49 = vector.load %arg14[%c0_29, %c0_30] : memref<2x1xf32, #tpu.memory_space<vmem>>, vector<2x1xf32>
      %50 = tpu.reciprocal %49 {approx = true} : vector<2x1xf32> -> vector<2x1xf32>
      %c0_31 = arith.constant 0 : index
      %c0_32 = arith.constant 0 : index
      %51 = vector.load %arg14[%c0_31, %c0_32] : memref<2x1xf32, #tpu.memory_space<vmem>>, vector<2x1xf32>
      %52 = arith.mulf %51, %50 : vector<2x1xf32>
      %cst_33 = arith.constant 2.000000e+00 : f32
      %53 = vector.broadcast %cst_33 : f32 to vector<2x1xf32>
      %54 = arith.subf %53, %52 : vector<2x1xf32>
      %55 = arith.mulf %50, %54 : vector<2x1xf32>
      %c0_34 = arith.constant 0 : index
      %c0_35 = arith.constant 0 : index
      %56 = vector.load %arg15[%c0_34, %c0_35] : memref<2x32xf32, #tpu.memory_space<vmem>>, vector<2x32xf32>
      %57 = vector.broadcast %55 : vector<2x1xf32> to vector<2x32xf32>
      %58 = arith.mulf %56, %57 : vector<2x32xf32>
      %c0_36 = arith.constant 0 : index
      %c0_37 = arith.constant 0 : index
      %59 = vector.load %arg11[%c0_36, %c0_37] : memref<2x32xf32, #tpu.memory_space<vmem>>, vector<2x32xf32>
      tpu.vector_store %arg11[%c0_36, %c0_37], %58 {strides = array<i32>} : memref<2x32xf32, #tpu.memory_space<vmem>>, vector<2x32xf32>,
      %c0_38 = arith.constant 0 : index
      %c0_39 = arith.constant 0 : index
      %c0_40 = arith.constant 0 : index
      %60 = vector.load %arg12[%c0_38, %c0_39, %c0_40] : memref<1x2x8xf32, #tpu.memory_space<vmem>>, vector<1x2x8xf32>
      %c0_41 = arith.constant 0 : index
      %c0_42 = arith.constant 0 : index
      %61 = vector.load %arg13[%c0_41, %c0_42] : memref<2x1xf32, #tpu.memory_space<vmem>>, vector<2x1xf32>
      %62 = vector.shape_cast %61 : vector<2x1xf32> to vector<1x2x1xf32>
      %63 = vector.broadcast %62 : vector<1x2x1xf32> to vector<1x2x8xf32>
      %64 = arith.subf %60, %63 : vector<1x2x8xf32>
      %65 = math.exp %64 : vector<1x2x8xf32>
      %66 = vector.shape_cast %55 : vector<2x1xf32> to vector<1x2x1xf32>
      %67 = vector.broadcast %66 : vector<1x2x1xf32> to vector<1x2x8xf32>
      %68 = arith.mulf %65, %67 : vector<1x2x8xf32>
      %c0_43 = arith.constant 0 : index
      %c0_44 = arith.constant 0 : index
      %c0_45 = arith.constant 0 : index
      %69 = vector.load %arg12[%c0_43, %c0_44, %c0_45] : memref<1x2x8xf32, #tpu.memory_space<vmem>>, vector<1x2x8xf32>
      tpu.vector_store %arg12[%c0_43, %c0_44, %c0_45], %68 {strides = array<i32>} : memref<1x2x8xf32, #tpu.memory_space<vmem>>, vector<1x2x8xf32>,
      %c0_46 = arith.constant 0 : index
      %c0_47 = arith.constant 0 : index
      %70 = vector.load %arg6[%c0_46, %c0_47] : memref<32x16xf32, #tpu.memory_space<vmem>>, vector<32x16xf32>
      %cst_48 = arith.constant dense<0.000000e+00> : vector<2x16xf32>
      %71 = tpu.matmul %58, %70, %cst_48 {dimension_numbers = #tpu.dot_dimension_numbers<[1], [0], [0], [1], [0, 0, 1, 1], [], []>} : vector<2x32xf32>, vector<32x16xf32>, vector<2x16xf32> -> vector<2x16xf32>
      %c0_49 = arith.constant 0 : index
      %c0_50 = arith.constant 0 : index
      %72 = vector.load %arg7[%c0_49, %c0_50] : memref<1x16xf32, #tpu.memory_space<vmem>>, vector<1x16xf32>
      %73 = vector.broadcast %72 : vector<1x16xf32> to vector<2x16xf32>
      %74 = arith.addf %71, %73 : vector<2x16xf32>
      %cst_51 = arith.constant 0.000000e+00 : f32
      %75 = vector.broadcast %cst_51 : f32 to vector<2x16xf32>
      %76 = arith.maximumf %74, %75 : vector<2x16xf32>
      %c0_52 = arith.constant 0 : index
      %c0_53 = arith.constant 0 : index
      %77 = vector.load %arg8[%c0_52, %c0_53] : memref<16x3xf32, #tpu.memory_space<vmem>>, vector<16x3xf32>
      %cst_54 = arith.constant dense<0.000000e+00> : vector<2x3xf32>
      %78 = tpu.matmul %76, %77, %cst_54 {dimension_numbers = #tpu.dot_dimension_numbers<[1], [0], [0], [1], [0, 0, 1, 1], [], []>} : vector<2x16xf32>, vector<16x3xf32>, vector<2x3xf32> -> vector<2x3xf32>
      %c0_55 = arith.constant 0 : index
      %c0_56 = arith.constant 0 : index
      %79 = vector.load %arg9[%c0_55, %c0_56] : memref<1x3xf32, #tpu.memory_space<vmem>>, vector<1x3xf32>
      %80 = vector.broadcast %79 : vector<1x3xf32> to vector<2x3xf32>
      %81 = arith.addf %78, %80 : vector<2x3xf32>
      %c0_57 = arith.constant 0 : index
      %c0_58 = arith.constant 0 : index
      %82 = vector.load %arg10[%c0_57, %c0_58] : memref<2x3xf32, #tpu.memory_space<vmem>>, vector<2x3xf32>
      tpu.vector_store %arg10[%c0_57, %c0_58], %81 {strides = array<i32>} : memref<2x3xf32, #tpu.memory_space<vmem>>, vector<2x3xf32>,
    } else {
    }
    return
  }
  func.func @transform_0(%arg0: i32, %arg1: i32) -> (i32, i32, i32) {
    %c0_i32 = arith.constant 0 : i32
    %c0_i32_0 = arith.constant 0 : i32
    return %arg0, %arg1, %c0_i32 : i32, i32, i32
  }
  func.func @transform_1(%arg0: i32, %arg1: i32) -> (i32, i32) {
    %c0_i32 = arith.constant 0 : i32
    %c0_i32_0 = arith.constant 0 : i32
    %c0_i32_1 = arith.constant 0 : i32
    return %c0_i32, %c0_i32_0 : i32, i32
  }
  func.func @transform_2(%arg0: i32, %arg1: i32) -> (i32, i32) {
    %c0_i32 = arith.constant 0 : i32
    %c0_i32_0 = arith.constant 0 : i32
    %c0_i32_1 = arith.constant 0 : i32
    return %c0_i32, %c0_i32_0 : i32, i32
  }
  func.func @transform_3(%arg0: i32, %arg1: i32) -> (i32, i32) {
    %c0_i32 = arith.constant 0 : i32
    %c0_i32_0 = arith.constant 0 : i32
    %c0_i32_1 = arith.constant 0 : i32
    return %c0_i32, %c0_i32_0 : i32, i32
  }
  func.func @transform_4(%arg0: i32, %arg1: i32) -> (i32, i32) {
    %c0_i32 = arith.constant 0 : i32
    %c0_i32_0 = arith.constant 0 : i32
    %c0_i32_1 = arith.constant 0 : i32
    return %c0_i32, %c0_i32_0 : i32, i32
  }
  func.func @transform_5(%arg0: i32, %arg1: i32) -> (i32, i32) {
    %c0_i32 = arith.constant 0 : i32
    %c0_i32_0 = arith.constant 0 : i32
    %c0_i32_1 = arith.constant 0 : i32
    return %c0_i32, %c0_i32_0 : i32, i32
  }
  func.func @transform_6(%arg0: i32, %arg1: i32) -> (i32, i32) {
    %c0_i32 = arith.constant 0 : i32
    %c0_i32_0 = arith.constant 0 : i32
    %c0_i32_1 = arith.constant 0 : i32
    return %c0_i32, %c0_i32_0 : i32, i32
  }
  func.func @transform_7(%arg0: i32, %arg1: i32) -> (i32, i32) {
    %c0_i32 = arith.constant 0 : i32
    %c0_i32_0 = arith.constant 0 : i32
    %c0_i32_1 = arith.constant 0 : i32
    return %c0_i32, %c0_i32_0 : i32, i32
  }
  func.func @transform_8(%arg0: i32, %arg1: i32) -> (i32, i32) {
    %c0_i32 = arith.constant 0 : i32
    %c0_i32_0 = arith.constant 0 : i32
    return %arg0, %c0_i32 : i32, i32
  }
  func.func @transform_9(%arg0: i32, %arg1: i32) -> (i32, i32) {
    %c0_i32 = arith.constant 0 : i32
    %c0_i32_0 = arith.constant 0 : i32
    return %arg0, %c0_i32 : i32, i32
  }
  func.func @transform_10(%arg0: i32, %arg1: i32) -> (i32, i32, i32) {
    %c0_i32 = arith.constant 0 : i32
    %c0_i32_0 = arith.constant 0 : i32
    %c0_i32_1 = arith.constant 0 : i32
    return %c0_i32, %arg0, %c0_i32_0 : i32, i32, i32
  }
}

</mosaic_0001>

<bundles_post_ra>
// kernel: custom-call.3
= control target key start
LH: loop header
LB: loop body
LE: loop exit
PB: predicated region body
PF: predicated region fallthrough
CT: control target
= control target key end

     0   :  { %s6_s0 = inlined_call_operand.vmem [shape: f32[2,16], index: 0, kind: output, shape index: {}]  }

// kernel: custom-call.2
= control target key start
LH: loop header
LB: loop body
LE: loop exit
PB: predicated region body
PF: predicated region fallthrough
CT: control target
= control target key end

     0   :  { %s6_s0 = inlined_call_operand.vmem [shape: bf16[2,16], index: 0, kind: output, shape index: {}]  }

// kernel: sentiment_forward.1
= control target key start
LH: loop header
LB: loop body
LE: loop exit
PB: predicated region body
PF: predicated region fallthrough
CT: control target
= control target key end

     0   :  { %16 = vsyncpa [#allocation6], 0  ;;  %s582_s0 = inlined_call_operand.vmem [shape: f32[2,8,32], index: 0, kind: input, shape index: {}]   ;;  %s583_s1 = inlined_call_operand.vmem [shape: f32[32,32], index: 1, kind: input, shape index: {}]   ;;  %s584_s2 = inlined_call_operand.vmem [shape: f32[1,32], index: 2, kind: input, shape index: {}]   ;;  %s585_s3 = inlined_call_operand.vmem [shape: f32[1,32], index: 3, kind: input, shape index: {}]   ;;  %s586_s4 = inlined_call_operand.vmem [shape: f32[32,16], index: 4, kind: input, shape index: {}]   ;;  %s587_s5 = inlined_call_operand.vmem [shape: f32[1,16], index: 5, kind: input, shape index: {}]   ;;  %s588_s6 = inlined_call_operand.vmem [shape: f32[16,3], index: 6, kind: input, shape index: {}]   ;;  %s589_s7 = inlined_call_operand.vmem [shape: f32[1,3], index: 7, kind: input, shape index: {}]   ;;  %s590_s8 = inlined_call_operand.hbm [shape: f32[2,3], index: 8, kind: output, shape index: {0}]   ;;  %s591_s9 = inlined_call_operand.hbm [shape: f32[2,32], index: 9, kind: output, shape index: {1}]   ;;  %s592_s10 = inlined_call_operand.hbm [shape: f32[1,2,8], index: 10, kind: output, shape index: {2}]  }
   0x1   :  { %v48_v0 = vld [vmem:[%s583_s1 + $0x18] sm:$0xff]  ;;  %v47_v1 = vld [vmem:[%s583_s1 + $0x10] sm:$0xff]  ;;  %v46_v2 = vld [vmem:[%s583_s1 + $0x8] sm:$0xff] }
   0x2   :  { %72 = vmatpush.msra.mxu0 %v48_v0  ;;  %328 = vmatpush.msra.mxu3 %v48_v0 }
   0x4   :  { %73 = vmatpush.msra.mxu0 %v47_v1  ;;  %329 = vmatpush.msra.mxu3 %v47_v1 }
   0x5   :  { %17 = vsyncpa [#allocation8], 0  ;;  %v45_v3 = vld [vmem:[%s583_s1] sm:$0xff]  ;;  %vm53_vm0 = vcmask 261120   ;;  %v516_v5 = vld [vmem:[%s582_s0 + $0x8] sm:$0xff]  ;;  %v99_v19 = vlaneseq  ;;  %vm103_vm1 = vcmask 1041409  }
   0x6   :  { %74 = vmatpush.msra.mxu0 %v46_v2  ;;  %330 = vmatpush.msra.mxu3 %v46_v2  ;;  %v511_v4 = vld [vmem:[%s582_s0] sm:$0xff]  ;;  %vm108_vm2 = vcmask 58368   ;;  %vm38_vm3 = vcmask 1024   ;;  %v435_v26 = vmov -inf   ;;  %v436_v27 = vmov 0   ;;  %s295_s20 = sshll.u32 %s591_s9, 4  ;;  %s296_s20 = int_to_ptr.hbm [resolvable:$true] %s295_s20 }
   0x7   :  { %v341_v6 = vld [vmem:[%s584_s2] ss:$0 sm:$0xff]  ;;  %v100_v20 = vand.u32 127, %v99_v19  ;;  %39 = vst.msk [vmem:[#allocation2] sm:$0x3] %vm38_vm3, %v435_v26  ;;  %338 = vset.pattern.permute.xlu1 %v436_v27  ;;  %339 = vset.pattern.permute.xlu2 %v436_v27  ;;  %v437_v28 = vmov 0.0  }
   0x8   :  { %75 = vmatpush.msra.mxu0 %v45_v3  ;;  %331 = vmatpush.msra.mxu3 %v45_v3  ;;  %v342_v10 = vld [vmem:[%s585_s3] ss:$0 sm:$0xff]  ;;  %40 = vst.msk [vmem:[#allocation3] sm:$0x3] %vm38_vm3, %v437_v28  ;;  %vm41_vm4 = vcmask 254976   ;;  %vm251_vm5 = vcmask 130048  }
   0x9   :  { %324 = vmatmul.msk.f32.vlgmr.msra.gmra.mxu0 %vm53_vm0, %v511_v4  ;;  %325 = vmatmul.msk.f32.vlgmr.msra.gmra.mxu3 %vm53_vm0, %v516_v5  ;;  %42 = vst.msk [vmem:[#allocation4] sm:$0x3] %vm41_vm4, %v437_v28  ;;  %s438_s21 = smov [#allocation7]   ;;  %s306_s24 = sshll.u32 %s592_s10, 4  ;;  %vm275_vm6 = vcmask 17408   ;;  %s307_s24 = int_to_ptr.hbm [resolvable:$true] %s306_s24 }
   0xa   :  { %340 = vset.pattern.permute.xlu0 %v436_v27  ;;  %s293_s22 = sshll.u32 %s438_s21, 4  ;;  %s439_s1 = smov [#allocation9]   ;;  %s294_s22 = int_to_ptr.vmem [resolvable:$true] %s293_s22 }
   0xb   :  { %s440_s27 = smov [#allocation5]   ;;  %s284_s3 = sshll.u32 %s590_s8, 4  ;;  %s285_s3 = int_to_ptr.hbm [resolvable:$true] %s284_s3 }
   0xc   :  { %s282_s9 = sshll.u32 %s440_s27, 4  ;;  %s283_s9 = int_to_ptr.vmem [resolvable:$true] %s282_s9 }
   0xe   :  { %v110_v29 = vld [vmem:[#allocation2] sm:$0x3] }
  0x10   :  { %v152_v1 = vld [vmem:[#allocation4] sm:$0x3] }
  0x86   :  { %v77_v7 = vpop.f32.mrf.mxu0 }
  0x87   :  { %v78_v8 = vadd.f32 %v341_v6, %v77_v7 }
  0x89   :  { %345 = vtanh.f32 %v78_v8  ;;  %v216_v8 = vld [vmem:[%s586_s4 + $0x18] sm:$0xff] }
  0x8a   :  { %236 = vmatpush.msra.mxu1 %v216_v8 }
  0x8c   :  { %v80_v9 = vpop.f32.mrf.mxu3 }
  0x8d   :  { %v81_v11 = vadd.f32 %v341_v6, %v80_v9  ;;  %v215_v9 = vld [vmem:[%s586_s4 + $0x10] sm:$0xff] }
  0x8e   :  { %237 = vmatpush.msra.mxu1 %v215_v9 }
  0x8f   :  { %v346_v12 = vpop.eup %345  ;;  %347 = vtanh.f32 %v81_v11  ;;  %v132_v11 = vld [vmem:[#allocation3] sm:$0x3] }
  0x90   :  { %v89_v13 = vmul.f32 %v346_v12, %v342_v10 }
  0x92   :  { %v91_v14 = vsel %vm53_vm0, %v89_v13, 0.0 }
  0x93   :  { %92 = vadd.xlane.f32.xlu0 %v91_v14 }
  0x95   :  { %v348_v15 = vpop.eup %347 }
  0x96   :  { %v90_v16 = vmul.f32 %v348_v15, %v342_v10  ;;  %v214_v10 = vld [vmem:[%s586_s4 + $0x8] sm:$0xff] }
  0x97   :  { %238 = vmatpush.msra.mxu1 %v214_v10 }
  0x98   :  { %v94_v17 = vsel %vm53_vm0, %v90_v16, 0.0 }
  0x9b   :  { %95 = vadd.xlane.f32.xlu0 %v94_v17 }
 0x106   :  { %v93_v18 = vpop.xlane.xlu0 %92 }
 0x107   :  { %v101_v22 = vperm.slane %v93_v18, %v100_v20 }
 0x10e   :  { %v96_v21 = vpop.xlane.xlu0 %95 }
 0x10f   :  { %v102_v23 = vperm.slane %v96_v21, %v100_v20 }
 0x111   :  { %v104_v24 = vsel %vm103_vm1, %v102_v23, %v101_v22 }
 0x112   :  { %v111_v25 = vsel %vm108_vm2, %v104_v24, -inf  ;;  %109 = vst.msk [vmem:[#allocation9] sm:$0x3] %vm108_vm2, %v104_v24 }
 0x113   :  { %112 = vmax.xlane.f32.xlu1 %v111_v25 }
 0x119   :  { %v201_v22 = vld [vmem:[#allocation9] sm:$0x3] }
 0x186   :  { %v113_v30 = vpop.xlane.xlu1 %112 }
 0x187   :  { %v114_v31 = vmax.f32 %v110_v29, %v113_v30  ;;  %v246_v30 = vld [vmem:[%s588_s6 + $0x8] sm:$0xff] }
 0x188   :  { %269 = vmatpush.msra.mxu2 %v246_v30 }
 0x189   :  { %v115_v32 = vsub.f32 %v110_v29, %v114_v31  ;;  %184 = vst.msk [vmem:[#allocation2] sm:$0x3] %vm38_vm3, %v114_v31  ;;  %120 = vperm.xlu1 %338, %v114_v31   ;;  %v245_v31 = vld [vmem:[%s588_s6] sm:$0xff] }
 0x18a   :  { %270 = vmatpush.msra.mxu2 %v245_v31 }
 0x18b   :  { %v116_v41 = vmul.f32 1.442695, %v115_v32  ;;  %v343_v32 = vld [vmem:[%s587_s5] ss:$0 sm:$0xff]  ;;  %s304_s5 = sshll.u32 %s439_s1, 4  ;;  %s305_s5 = int_to_ptr.vmem [resolvable:$true] %s304_s5 }
 0x190   :  { %v202_v44 = vld [vmem:[#allocation2] sm:$0x3] }
 0x1fb   :  { %v121_v33 = vpop.permute.xlu1 %120 }
 0x1fc   :  { %v122_v34 = vperm.slane %v121_v33, 0  ;;  %v123_v35 = vperm.slane %v121_v33, 1 }
 0x1fe   :  { %v126_v36 = vsub.f32 %v93_v18, %v122_v34  ;;  %v127_v38 = vsub.f32 %v96_v21, %v123_v35 }
 0x200   :  { %v128_v37 = vmul.f32 1.442695, %v126_v36  ;;  %v130_v39 = vmul.f32 1.442695, %v127_v38  ;;  %v344_v36 = vld [vmem:[%s589_s7] ss:$0 sm:$0xff] }
 0x202   :  { %349 = vpow2.f32 %v128_v37 }
 0x203   :  { %351 = vpow2.f32 %v130_v39 }
 0x204   :  { %353 = vpow2.f32 %v116_v41 }
 0x208   :  { %v350_v40 = vpop.eup %349 }
 0x209   :  { %137 = vperm.xlu2 %339, %v350_v40   ;;  %v352_v42 = vpop.eup %351 }
 0x20a   :  { %v354_v43 = vpop.eup %353 }
 0x20b   :  { %v133_v12 = vmul.f32 %v354_v43, %v132_v11 }
 0x211   :  { %140 = vperm.xlu2 %339, %v352_v42  }
 0x219   :  { %155 = vperm.xlu2 %339, %v354_v43  }
 0x221   :  { %205 = vperm.xlu2 %339, %v202_v44  }
 0x263   :  { %v138_v45 = vpop.permute.xlu2 %137 }
 0x264   :  { %v161_v46 = vmul.f32 %v138_v45, %v511_v4  ;;  %v142_v51 = vperm.slane %v138_v45, %v100_v20 }
 0x266   :  { %v163_v47 = vsel %vm53_vm0, %v161_v46, 0.0 }
 0x267   :  { %v164_v48 = vrot.slane %v163_v47, 4 }
 0x269   :  { %v165_v49 = vadd.f32 %v164_v48, %v163_v47 }
 0x26b   :  { %v141_v50 = vpop.permute.xlu2 %140  ;;  %v166_v54 = vrot.slane %v165_v49, 2 }
 0x26c   :  { %v143_v52 = vperm.slane %v141_v50, %v100_v20  ;;  %v162_v53 = vmul.f32 %v141_v50, %v516_v5  ;;  %v213_v20 = vld [vmem:[%s586_s4] sm:$0xff] }
 0x26d   :  { %v167_v59 = vadd.f32 %v166_v54, %v165_v49  ;;  %239 = vmatpush.msra.mxu1 %v213_v20 }
 0x26e   :  { %v170_v55 = vsel %vm53_vm0, %v162_v53, 0.0  ;;  %v144_v56 = vsel %vm103_vm1, %v143_v52, %v142_v51 }
 0x26f   :  { %v171_v57 = vrot.slane %v170_v55, 4  ;;  %v146_v58 = vsel %vm108_vm2, %v144_v56, 0.0  ;;  %v168_v62 = vrot.slane %v167_v59, 1 }
 0x270   :  { %147 = vadd.xlane.f32.xlu0 %v146_v58 }
 0x271   :  { %v172_v60 = vadd.f32 %v171_v57, %v170_v55  ;;  %v169_v3 = vadd.f32 %v168_v62, %v167_v59 }
 0x273   :  { %v173_v61 = vrot.slane %v172_v60, 2  ;;  %v156_v2 = vpop.permute.xlu2 %155 }
 0x274   :  { %v158_v5 = vmul.f32 %v156_v2, %v152_v1 }
 0x275   :  { %v174_v63 = vadd.f32 %v173_v61, %v172_v60 }
 0x277   :  { %v175_v0 = vrot.slane %v174_v63, 1 }
 0x279   :  { %v176_v4 = vadd.f32 %v175_v0, %v174_v63 }
 0x27b   :  { %v179_v6 = vsel %vm103_vm1, %v176_v4, %v169_v3  ;;  %v206_v21 = vpop.permute.xlu2 %205 }
 0x27c   :  { %v181_v7 = vadd.f32 %v179_v6, %v158_v5  ;;  %v208_v23 = vsub.f32 %v201_v22, %v206_v21 }
 0x27e   :  { %183 = vst.msk [vmem:[#allocation4] sm:$0x3] %vm41_vm4, %v181_v7  ;;  %v209_v24 = vmul.f32 1.442695, %v208_v23 }
 0x285   :  { %v193_v26 = vld [vmem:[#allocation4] sm:$0x3] }
 0x2e3   :  { %v148_v13 = vpop.xlane.xlu0 %147 }
 0x2e4   :  { %v149_v14 = vadd.f32 %v148_v13, %v133_v12 }
 0x2e6   :  { %151 = vst.msk [vmem:[#allocation3] sm:$0x3] %vm38_vm3, %v149_v14 }
 0x2ed   :  { %v188_v15 = vld [vmem:[#allocation3] sm:$0x3] }
 0x2ee   :  { %355 = vrcp.f32 %v188_v15 }
 0x2ef   :  { %357 = vpow2.f32 %v209_v24 }
 0x2f4   :  { %v356_v16 = vpop.eup %355 }
 0x2f5   :  { %v190_v17 = vmul.f32 %v356_v16, %v188_v15  ;;  %v358_v25 = vpop.eup %357 }
 0x2f7   :  { %v191_v18 = vsub.f32 2.0, %v190_v17 }
 0x2f9   :  { %v192_v19 = vmul.f32 %v356_v16, %v191_v18 }
 0x2fb   :  { %196 = vperm.xlu0 %340, %v192_v19  }
 0x36d   :  { %v197_v27 = vpop.permute.xlu0 %196 }
 0x36e   :  { %v199_v28 = vmul.f32 %v197_v27, %v193_v26  ;;  %v211_v29 = vmul.f32 %v358_v25, %v197_v27 }
 0x370   :  { %200 = vst.msk [vmem:[#allocation7] sm:$0x3] %vm41_vm4, %v199_v28  ;;  %326 = vmatmul.msk.f32.vlgmr.msra.gmra.mxu1 %vm53_vm0, %v199_v28 }
 0x371   :  { %212 = vst.msk [vmem:[#allocation9] sm:$0x3] %vm108_vm2, %v211_v29  ;;  %298 = dma.vmem_to_hbm [thread:$0]  %s294_s22, 32, %s296_s20, [#allocation8]  }
 0x372   :  { %309 = dma.vmem_to_hbm [thread:$0]  %s305_s5, 32, %s307_s24, [#allocation8]  }
 0x3ed   :  { %v241_v33 = vpop.f32.mrf.mxu1 }
 0x3ee   :  { %v242_v34 = vadd.f32 %v343_v32, %v241_v33 }
 0x3f0   :  { %v244_v35 = vmax.f32 %v242_v34, 0.0 }
 0x3f2   :  { %327 = vmatmul.msk.f32.vlgmr.msra.gmra.mxu2 %vm251_vm5, %v244_v35 }
 0x475   :  { %v272_v37 = vpop.f32.mrf.mxu2 }
 0x476   :  { %v273_v38 = vadd.f32 %v344_v36, %v272_v37 }
 0x478   :  { %276 = vst.msk [vmem:[#allocation5] sm:$0x3] %vm275_vm6, %v273_v38 }
 0x479   :  { %287 = dma.vmem_to_hbm [thread:$0]  %s283_s9, 32, %s285_s3, [#allocation6]  }
 0x47a   :  { %431 = dma.done.wait [#allocation6], 32  }
 0x47b   :  { %432 = vsyncadd [#allocation6], 4294967264 }
 0x47c   :  { %433 = dma.done.wait [#allocation8], 64  }
 0x47d   :  { %434 = vsyncadd [#allocation8], 4294967232 }
 0x47e   :  { %322 = vsyncpa [#allocation6], 1 }
 0x47f   :  { %323 = vsyncpa [#allocation8], 1 }

</bundles_post_ra>
